<compile_context>
chip_gen: v7x
topology: tpu7x:2x2x1
jax: 0.10.0
libtpu: 0.0.40
codegen_flags: <defaults>
</compile_context>

<pallas_src>
import functools

import jax
import jax.numpy as jnp
import numpy as np
from jax import lax
from jax.experimental import pallas as pl
from jax.experimental.pallas import tpu as pltpu


# ----------------------- host-side parameter setup (numpy) ----------------------- #
def generate_base_anchors_np(base_size, ratios, scales):
    """(A, 4) base anchors, identical to the torch module's generate_base_anchors."""
    ratios = np.asarray(ratios, np.float32)
    scales = np.asarray(scales, np.float32)
    h_ratio = np.sqrt(ratios)
    w_ratio = 1.0 / h_ratio
    w = (base_size * w_ratio[:, None] * scales[None, :]).reshape(-1)
    h = (base_size * h_ratio[:, None] * scales[None, :]).reshape(-1)
    return np.stack([-0.5 * w, -0.5 * h, 0.5 * w, 0.5 * h], axis=-1).astype(np.float32)


def _level_constants_np(base_anchors, W, stride):
    """Per-column constants for the lane-dense (H, W*A*4) output layout.

    Column c encodes (w, a, coord) with c = w*A*4 + a*4 + coord and
      value(h, c) = base[a, coord] + stride * (w  if coord is an x-coord else h)
                  = const_row[c]   + y_coef[c] * h
    """
    A = base_anchors.shape[0]
    C = W * A * 4
    coord = np.tile(np.arange(4), W * A)                        # 0,1,2,3 repeating
    x_of_col = np.repeat(np.arange(W), A * 4).astype(np.float32)
    is_x = (coord % 2 == 0).astype(np.float32)                  # x1 / x2 columns
    base_col = np.tile(base_anchors.reshape(-1), W).astype(np.float32)
    const_row = base_col + np.float32(stride) * x_of_col * is_x
    y_coef = np.float32(stride) * (1.0 - is_x)
    return const_row.reshape(1, C), y_coef.reshape(1, C)


# --------------------------------- kernel ----------------------------------- #
def _grid_anchor_kernel(const_ref, ycoef_ref, out_ref, *, tile_h):
    """out[h, c] = const_row[c] + y_coef[c] * y(h) — one broadcasted FMA per element.

    const_ref, ycoef_ref: (1, C) f32 (resident across the whole grid)
    out_ref             : (tile_h, C) f32 (lane-dense, C = W*A*4 = full last dim)
    """
    i = pl.program_id(0)
    y = (lax.broadcasted_iota(jnp.int32, (tile_h, 1), 0) + i * tile_h).astype(jnp.float32)
    out_ref[...] = const_ref[...] + ycoef_ref[...] * y


def grid_anchors_level(base_anchors_np, H, W, stride, *, target_tile_bytes=2 << 20):
    """Run the Pallas kernel for one pyramid level -> (H*W*A, 4) float32."""
    A = base_anchors_np.shape[0]
    C = W * A * 4
    const_row, y_coef = _level_constants_np(base_anchors_np, W, stride)

    # Tile the H axis: largest sublane-aligned tile under ~target_tile_bytes so the
    # output block double-buffers comfortably within scoped VMEM on all chips
    # (v7x included: 2 MiB block * 2 buffers << 32 MiB scoped / 64 MiB physical).
    row_bytes = C * 4
    tile_h = max(1, target_tile_bytes // row_bytes)
    if tile_h >= H or H <= 8:
        tile_h = H                               # single full-height block
    else:
        tile_h = max(8, (tile_h // 8) * 8)       # sublane-aligned (8) tile, < H

    grid = (pl.cdiv(H, tile_h),)
    out = pl.pallas_call(
        functools.partial(_grid_anchor_kernel, tile_h=tile_h),
        out_shape=jax.ShapeDtypeStruct((H, C), jnp.float32),
        grid=grid,
        in_specs=[
            pl.BlockSpec((1, C), lambda i: (0, 0)),   # per-column const (fetched once)
            pl.BlockSpec((1, C), lambda i: (0, 0)),   # per-column y coefficient
        ],
        out_specs=pl.BlockSpec((tile_h, C), lambda i: (i, 0)),
        compiler_params=pltpu.CompilerParams(dimension_semantics=("parallel",)),
    )(jnp.asarray(const_row), jnp.asarray(y_coef))
    # Pure view: (H, W*A*4) -> (H*W*A, 4), matching torch meshgrid/flatten order.
    return out.reshape(H * W * A, 4)


# ------------------------------ module wrapper ------------------------------ #
def anchors_forward(cfg, image_size, dtype=jnp.float32, *, target_tile_bytes=2 << 20):
    strides = cfg["strides"]
    base_sizes = cfg.get("base_sizes", list(strides))
    num_anchors = len(cfg["ratios"]) * len(cfg["scales"])
    assert num_anchors == cfg["num"], (
        f"the number of anchors per grid should be equal to len(ratios) * len(scales),"
        f"but got {cfg['num']} and {num_anchors}"
    )

    all_anchors = []
    for idx, stride in enumerate(strides):
        # feature_shape = trunc-div(image_shape + stride - 1, stride)
        H = (image_size[0] + stride - 1) // stride
        W = (image_size[1] + stride - 1) // stride
        base = generate_base_anchors_np(float(base_sizes[idx]), cfg["ratios"], cfg["scales"])
        all_anchors.append(
            grid_anchors_level(base, H, W, stride, target_tile_bytes=target_tile_bytes)
        )
    # TODO(synk): fully fusing all pyramid levels into one pallas_call (writing the
    # concatenated buffer directly) needs a common lane width across levels; levels
    # have different W*A*4, so the concat stays as a single cheap jnp.concatenate.
    return jnp.concatenate(all_anchors, axis=0).astype(dtype)


# -------------------------------- reference --------------------------------- #
def anchors_reference_np(cfg, image_size):
    strides = cfg["strides"]
    base_sizes = cfg.get("base_sizes", list(strides))
    ratios = np.asarray(cfg["ratios"], np.float32)
    scales = np.asarray(cfg["scales"], np.float32)
    all_anchors = []
    for idx, stride in enumerate(strides):
        H = (image_size[0] + stride - 1) // stride
        W = (image_size[1] + stride - 1) // stride
        h_ratio = np.sqrt(ratios)
        w_ratio = 1.0 / h_ratio
        w = (base_sizes[idx] * w_ratio[:, None] * scales[None, :]).reshape(-1)
        h = (base_sizes[idx] * h_ratio[:, None] * scales[None, :]).reshape(-1)
        base = np.stack([-0.5 * w, -0.5 * h, 0.5 * w, 0.5 * h], axis=-1)  # (A, 4)
        grid_x = np.arange(0, W) * stride
        grid_y = np.arange(0, H) * stride
        xx = np.tile(grid_x, H)
        yy = np.repeat(grid_y, W)
        shift = np.stack([xx, yy, xx, yy], axis=-1).astype(np.float32)  # (H*W, 4)
        ga = base[None, :, :] + shift[:, None, :]
        all_anchors.append(ga.reshape(-1, 4))
    return np.concatenate(all_anchors, axis=0)


# ----------------------------------- main ------------------------------------ #
if __name__ == "__main__":
    cfg = {
        "strides": [8, 16],
        "ratios": [0.5, 1.0, 2.0],
        "scales": [1.0, 2.0],
        "num": 6,
    }

    # Deterministic dummy image just to define image_size (NCHW like PyTorch).
    key = jax.random.PRNGKey(0)
    image = jax.random.normal(key, (2, 3, 32, 32), dtype=jnp.float32)
    image_size = (image.shape[2], image.shape[3])  # (H, W) = (32, 32)

    anchors = anchors_forward(cfg, image_size, dtype=jnp.float32)
    anchors = jax.block_until_ready(anchors)
    ref = anchors_reference_np(cfg, image_size)
    assert anchors.shape == ref.shape, (anchors.shape, ref.shape)
    np.testing.assert_allclose(np.asarray(anchors), ref, rtol=1e-5, atol=1e-5)

    # Second check: non-divisible feature map + tiny tile budget to exercise the
    # multi-tile grid path (ragged last H tile) on the same code.
    image_size2 = (104, 96)
    anchors2 = anchors_forward(cfg, image_size2, dtype=jnp.float32, target_tile_bytes=2048)
    anchors2 = jax.block_until_ready(anchors2)
    ref2 = anchors_reference_np(cfg, image_size2)
    assert anchors2.shape == ref2.shape, (anchors2.shape, ref2.shape)
    np.testing.assert_allclose(np.asarray(anchors2), ref2, rtol=1e-5, atol=1e-5)

    print("KERNEL_OK")
</pallas_src>

<mosaic_0001>
module attributes {stable_mosaic.version = 11 : i64} {
  func.func @_grid_anchor_kernel(%arg0: i32, %arg1: memref<1x96xf32, #tpu.memory_space<vmem>>, %arg2: memref<1x96xf32, #tpu.memory_space<vmem>>, %arg3: memref<4x96xf32, #tpu.memory_space<vmem>>) attributes {dimension_semantics = [#tpu.dimension_semantics<parallel>], iteration_bounds = array<i64: 1>, scalar_prefetch = 0 : i64, scratch_operands = 0 : i64, tpu.core_type = #tpu.core_type<tc>, window_params = [{pipeline_mode = #tpu.pipeline_mode<synchronous>, transform_indices = @transform_0, window_bounds = array<i64: 1, 96>}, {pipeline_mode = #tpu.pipeline_mode<synchronous>, transform_indices = @transform_1, window_bounds = array<i64: 1, 96>}, {transform_indices = @transform_2, window_bounds = array<i64: 4, 96>}]} {
    %0 = tpu.iota {dimensions = array<i32: 0>} : vector<4x1xi32>
    %c4_i32 = arith.constant 4 : i32
    %1 = arith.muli %arg0, %c4_i32 : i32
    %2 = vector.broadcast %1 : i32 to vector<4x1xi32>
    %3 = arith.addi %0, %2 : vector<4x1xi32>
    %4 = arith.sitofp %3 : vector<4x1xi32> to vector<4x1xf32>
    %c0 = arith.constant 0 : index
    %c0_0 = arith.constant 0 : index
    %5 = vector.load %arg1[%c0, %c0_0] : memref<1x96xf32, #tpu.memory_space<vmem>>, vector<1x96xf32>
    %c0_1 = arith.constant 0 : index
    %c0_2 = arith.constant 0 : index
    %6 = vector.load %arg2[%c0_1, %c0_2] : memref<1x96xf32, #tpu.memory_space<vmem>>, vector<1x96xf32>
    %7 = vector.broadcast %6 : vector<1x96xf32> to vector<4x96xf32>
    %8 = vector.broadcast %4 : vector<4x1xf32> to vector<4x96xf32>
    %9 = arith.mulf %7, %8 : vector<4x96xf32>
    %10 = vector.broadcast %5 : vector<1x96xf32> to vector<4x96xf32>
    %11 = arith.addf %10, %9 : vector<4x96xf32>
    %c0_3 = arith.constant 0 : index
    %c0_4 = arith.constant 0 : index
    %12 = vector.load %arg3[%c0_3, %c0_4] : memref<4x96xf32, #tpu.memory_space<vmem>>, vector<4x96xf32>
    tpu.vector_store %arg3[%c0_3, %c0_4], %11 {strides = array<i32>} : memref<4x96xf32, #tpu.memory_space<vmem>>, vector<4x96xf32>,
    return
  }
  func.func @transform_0(%arg0: i32) -> (i32, i32) {
    %c0_i32 = arith.constant 0 : i32
    %c0_i32_0 = arith.constant 0 : i32
    %c0_i32_1 = arith.constant 0 : i32
    return %c0_i32, %c0_i32_0 : i32, i32
  }
  func.func @transform_1(%arg0: i32) -> (i32, i32) {
    %c0_i32 = arith.constant 0 : i32
    %c0_i32_0 = arith.constant 0 : i32
    %c0_i32_1 = arith.constant 0 : i32
    return %c0_i32, %c0_i32_0 : i32, i32
  }
  func.func @transform_2(%arg0: i32) -> (i32, i32) {
    %c0_i32 = arith.constant 0 : i32
    %c0_i32_0 = arith.constant 0 : i32
    return %arg0, %c0_i32 : i32, i32
  }
}

</mosaic_0001>

<bundles_post_ra>
// kernel: tpu_custom_call.1
= control target key start
LH: loop header
LB: loop body
LE: loop exit
PB: predicated region body
PF: predicated region fallthrough
CT: control target
= control target key end

     0   :  { %7 = vsyncpa [#allocation3], 0  ;;  %s159_s0 = inlined_call_operand.hbm [shape: f32[1,96], index: 0, kind: input, shape index: {}]   ;;  %s160_s1 = inlined_call_operand.vmem [shape: f32[1,96], index: 1, kind: input, shape index: {}]   ;;  %s161_s2 = inlined_call_operand.hbm [shape: f32[4,96], index: 2, kind: output, shape index: {}]  }
   0x1   :  { %8 = vsyncpa [#allocation4], 0  ;;  %s115_s9 = smov [#allocation2]   ;;  %s67_s13 = scalar_lea.hbm %s159_s0, 16 }
   0x2   :  { %s15_s10 = sshll.u32 %s115_s9, 4  ;;  %p68_p0 = scmp.ne.s32.totalorder %s159_s0, %s67_s13  ;;  %s16_s10 = int_to_ptr.vmem [resolvable:$true] %s15_s10 }
   0x3   :  { %p71_p1 = scmp.lt.u32.totalorder %s67_s13, %s159_s0 }
   0x5   :  { %p73_p2 = pnand %p71_p1, %p68_p0 }
   0x7   :  { %76 = shalt.err (!%p73_p2)
}
   0x8   :  { %s77_s18 = scalar_lea.vmem %s16_s10, 16  ;;  %s81_s19 = scalar_lea.vmem %s16_s10, 32 }
   0x9   :  { %p78_p3 = scmp.ne.s32.totalorder %s16_s10, %s77_s18  ;;  %p82_p4 = scmp.lt.s32.totalorder %s16_s10, %s16_s10 }
   0xa   :  { %p83_p5 = scmp.lt.s32.totalorder %s81_s19, %s77_s18 }
   0xc   :  { %p84_p6 = por %p83_p5, %p82_p4 }
   0xe   :  { %p85_p7 = pnand %p84_p6, %p78_p3 }
  0x10   :  { %88 = shalt.err (!%p85_p7)
}
  0x11   :  { %18 = dma.hbm_to_vmem [thread:$0]  %s159_s0, 16, %s16_s10, [#allocation3]  }
  0x12   :  { %111 = dma.done.wait [#allocation3], 16  }
  0x13   :  { %112 = vsyncadd [#allocation3], 4294967280  ;;  %v24_v0 = vlaneseq  ;;  %v64_v3 = vld [vmem:[#allocation2] ss:$0 sm:$0xff]  ;;  %s116_s24 = smov [#allocation5]   ;;  %vm46_vm0 = vcmask 781312  }
  0x14   :  { %v63_v4 = vld [vmem:[%s160_s1] ss:$0 sm:$0xff]  ;;  %s54_s25 = sshll.u32 %s116_s24, 4  ;;  %s55_s25 = int_to_ptr.vmem [resolvable:$true] %s54_s25 }
  0x15   :  { %v25_v1 = vshrl.u32 %v24_v0, 7  ;;  %s89_s26 = scalar_lea.vmem %s55_s25, 64  ;;  %p94_p9 = scmp.lt.s32.totalorder %s55_s25, %s55_s25 }
  0x16   :  { %p90_p8 = scmp.ne.s32.totalorder %s55_s25, %s89_s26  ;;  %p95_p10 = scmp.lt.s32.totalorder %s89_s26, %s89_s26 }
  0x17   :  { %v29_v2 = vcvt.s32.f32 %v25_v1 }
  0x18   :  { %p96_p11 = por %p95_p10, %p94_p9 }
  0x19   :  { %v38_v5 = vmul.f32 %v63_v4, %v29_v2 }
  0x1a   :  { %p97_p12 = pnand %p96_p11, %p90_p8 }
  0x1b   :  { %v45_v6 = vadd.f32 %v64_v3, %v38_v5 }
  0x1d   :  { %47 = vst.msk [vmem:[#allocation5] sm:$0xf] %vm46_vm0, %v45_v6 }
  0x1e   :  { %100 = shalt.err (!%p97_p12)
}
  0x1f   :  { %s101_s28 = scalar_lea.hbm %s161_s2, 64 }
  0x20   :  { %p102_p13 = scmp.ne.s32.totalorder %s161_s2, %s101_s28  ;;  %p105_p0 = scmp.lt.u32.totalorder %s101_s28, %s161_s2 }
  0x22   :  { %p107_p1 = pnand %p105_p0, %p102_p13 }
  0x24   :  { %110 = shalt.err (!%p107_p1)
}
  0x25   :  { %57 = dma.vmem_to_hbm [thread:$0]  %s55_s25, 64, %s161_s2, [#allocation4]  }
  0x26   :  { %113 = dma.done.wait [#allocation4], 64  }
  0x27   :  { %114 = vsyncadd [#allocation4], 4294967232 }
  0x28   :  { %61 = vsyncpa [#allocation3], 1 }
  0x29   :  { %62 = vsyncpa [#allocation4], 1 }

</bundles_post_ra>
